<compile_context>
chip_gen: v7x
topology: tpu7x:2x2x1
jax: 0.10.0
libtpu: 0.0.40
codegen_flags: <defaults>
</compile_context>

<pallas_src>
import functools

import jax
import jax.numpy as jnp
from jax import lax
from jax.experimental import pallas as pl
from jax.experimental.pallas import tpu as pltpu


# ---------------------------------------------------------------------------
# Kernels
# ---------------------------------------------------------------------------

def _in_proj_qk_fused_kernel(x_ref, wt_ref, b_ref, q_ref, k_ref, *, scaling, embed_dim):
    # x_ref : (tm, E)    current row tile
    # wt_ref: (E, 2E)    pre-transposed weight (W.T) -> MXU-native (M,K)@(K,N)
    # b_ref : (2, E)     [0] = q bias, [1] = k bias
    # q_ref, k_ref: (tm, E)
    x = x_ref[...]
    out = lax.dot_general(x, wt_ref[...], (((1,), (0,)), ((), ())),
                          preferred_element_type=jnp.float32)
    q = out[:, :embed_dim]
    k = out[:, embed_dim:]
    q_ref[...] = ((q + b_ref[0:1, :]) * scaling).astype(q_ref.dtype)
    k_ref[...] = (k + b_ref[1:2, :]).astype(k_ref.dtype)


def _in_proj_qk_split_kernel(x_ref, wt_ref, b_ref, q_ref, k_ref, *, scaling):
    # x_ref : (tm, E)
    # wt_ref: (2, E, E)  wt_ref[j] = W_j.T (pre-transposed) -> MXU-native contraction
    # b_ref : (2, E)
    x = x_ref[...]
    dn = (((1,), (0,)), ((), ()))   # contract x's E with weight's first (input) dim
    q = lax.dot_general(x, wt_ref[0], dn, preferred_element_type=jnp.float32)
    k = lax.dot_general(x, wt_ref[1], dn, preferred_element_type=jnp.float32)
    q_ref[...] = ((q + b_ref[0:1, :]) * scaling).astype(q_ref.dtype)
    k_ref[...] = (k + b_ref[1:2, :]).astype(k_ref.dtype)


# ---------------------------------------------------------------------------
# Helpers
# ---------------------------------------------------------------------------

def _vmem_capacity_bytes():
    """Physical per-core VMEM (generation-aware); conservative default if unknown."""
    try:
        return int(pltpu.get_tpu_info().vmem_capacity_bytes)
    except Exception:
        return 64 << 20  # v7x per-TC value: safe lower bound for all generations


def _resident_spec(block_shape, index_map, single_buffer):
    """BlockSpec for a grid-invariant operand.

    When `single_buffer` (large resident weight), request 1-deep buffering so the
    operand is not pointlessly double-buffered -- halves its VMEM footprint.
    Falls back to the default spec if this jax version lacks pipeline_mode.
    """
    if single_buffer and hasattr(pl, "Buffered"):
        try:
            return pl.BlockSpec(block_shape, index_map, pipeline_mode=pl.Buffered(1))
        except TypeError:
            pass
    return pl.BlockSpec(block_shape, index_map)


def _choose_tm(m, embed_dim, itemsize, tile_budget_bytes):
    """Row-tile size.

    As large as the per-generation VMEM tile budget allows (amortizes the ~0.35us
    per-grid-step overhead; this kernel is HBM-bandwidth bound), but always >= 2
    row tiles when possible so v7x's two TensorCores both get work on the parallel
    row axis.
    """
    # Bytes per output row in flight: double-buffered x/q/k tiles plus the f32
    # matmul intermediate (2E lanes) produced inside the body.
    per_row = 2 * 3 * embed_dim * itemsize + 2 * embed_dim * 4
    cap = max(tile_budget_bytes // per_row, 8)

    if m <= cap:
        if m >= 16:
            # Whole array would fit in one tile: split into two sublane-aligned
            # half tiles instead so grid >= 2 (megacore sharding on v7x).
            return max((((m + 1) // 2) + 7) // 8 * 8, 8)
        return m  # tiny: block == full dim is always legal

    tm = 2048
    while tm > 8 and tm > cap:
        tm //= 2
    return min(tm, m)


# ---------------------------------------------------------------------------
# Wrapper
# ---------------------------------------------------------------------------

def scaled_dot_product_attention_fwd(query, key, in_proj_weight, in_proj_bias):
    """Mirrors ScaledDotProduct_attention.forward. `key` is unused (as in PyTorch)."""
    del key  # unused by the reference module
    tgt_len, bsz, embed_dim = query.shape
    two_e = 2 * embed_dim
    assert in_proj_weight.shape == (two_e, embed_dim)
    assert in_proj_bias.shape == (two_e,)

    scaling = float(embed_dim) ** (-0.5)
    m = tgt_len * bsz
    x2d = query.reshape(m, embed_dim)              # contiguous, no copy
    b2 = in_proj_bias.reshape(2, embed_dim)        # contiguous, no copy

    # Pre-transpose the weight ONCE in the wrapper (tiny 2E^2 XLA op) so the kernel
    # contracts the RHS's first dim -> MXU-native form, no per-step XLU relayout.
    fused = embed_dim <= 128   # one N=2E matmul fills the 256-wide MXU on v6e/v7x
    if fused:
        wt = in_proj_weight.T                                            # (E, 2E)
        w_block = (embed_dim, two_e)
        w_index = lambda i: (0, 0)
        kernel = functools.partial(_in_proj_qk_fused_kernel,
                                   scaling=scaling, embed_dim=embed_dim)
    else:
        wt = in_proj_weight.reshape(2, embed_dim, embed_dim).transpose(0, 2, 1)
        w_block = (2, embed_dim, embed_dim)
        w_index = lambda i: (0, 0, 0)
        kernel = functools.partial(_in_proj_qk_split_kernel, scaling=scaling)

    itemsize = jnp.dtype(query.dtype).itemsize
    w_bytes = two_e * embed_dim * jnp.dtype(in_proj_weight.dtype).itemsize
    b_bytes = two_e * jnp.dtype(in_proj_bias.dtype).itemsize

    # Generation-aware VMEM budget: ~85% of physical per-core VMEM, <= 100 MiB
    # (~108 MiB would be the 85% point on v5e/v6e; ~54 MiB on v7x).
    vmem_cap = _vmem_capacity_bytes()
    vmem_limit = int(min(int(0.85 * vmem_cap), 100 << 20))

    # Grid-invariant weight/bias: single-buffer when large so the resident footprint
    # is w_bytes (not 2*w_bytes) -- frees room for a bigger row tile tm.
    single_buffer_params = embed_dim >= 256
    w_buffers = 1 if single_buffer_params else 2
    resident_bytes = w_buffers * (w_bytes + b_bytes)
    tile_budget = max(vmem_limit - resident_bytes - (4 << 20), 4 << 20)

    tm = _choose_tm(m, embed_dim, itemsize, tile_budget)
    grid = (pl.cdiv(m, tm),)

    w_spec = _resident_spec(w_block, w_index, single_buffer_params)
    b_spec = _resident_spec((2, embed_dim), lambda i: (0, 0), single_buffer_params)

    cost = pl.CostEstimate(
        flops=2 * m * embed_dim * two_e,
        transcendentals=0,
        bytes_accessed=(3 * m * embed_dim + two_e * embed_dim + two_e) * itemsize,
    )

    q2d, k2d = pl.pallas_call(
        kernel,
        out_shape=(
            jax.ShapeDtypeStruct((m, embed_dim), query.dtype),
            jax.ShapeDtypeStruct((m, embed_dim), query.dtype),
        ),
        grid=grid,
        in_specs=[
            pl.BlockSpec((tm, embed_dim), lambda i: (i, 0)),   # x row tile (pipelined)
            w_spec,                                            # pre-transposed weight (resident)
            b_spec,                                            # bias (resident)
        ],
        out_specs=(
            pl.BlockSpec((tm, embed_dim), lambda i: (i, 0)),   # q
            pl.BlockSpec((tm, embed_dim), lambda i: (i, 0)),   # k
        ),
        compiler_params=pltpu.CompilerParams(
            dimension_semantics=("parallel",),
            vmem_limit_bytes=vmem_limit,
        ),
        cost_estimate=cost,
    )(x2d, wt, b2)

    q = q2d.reshape(tgt_len, bsz, embed_dim)
    k = k2d.reshape(tgt_len, bsz, embed_dim)
    return q, k


# ---------------------------------------------------------------------------
# Self-test
# ---------------------------------------------------------------------------

if __name__ == "__main__":
    tgt_len, bsz, embed_dim = 8, 2, 32

    key0 = jax.random.PRNGKey(0)
    k_q, k_kk, k_w, k_b = jax.random.split(key0, 4)

    query = jax.random.normal(k_q, (tgt_len, bsz, embed_dim), jnp.float32)
    key_in = jax.random.normal(k_kk, (tgt_len, bsz, embed_dim), jnp.float32)

    fan_in, fan_out = embed_dim, 2 * embed_dim
    bound = (6.0 / (fan_in + fan_out)) ** 0.5  # xavier_uniform bound
    in_proj_weight = jax.random.uniform(
        k_w, (2 * embed_dim, embed_dim), jnp.float32, -bound, bound)
    in_proj_bias = 0.1 * jax.random.normal(k_b, (2 * embed_dim,), jnp.float32)

    q, k = scaled_dot_product_attention_fwd(query, key_in, in_proj_weight, in_proj_bias)
    jax.block_until_ready((q, k))

    # Correctness check against plain-JAX reference of the PyTorch forward.
    ref = query.reshape(-1, embed_dim) @ in_proj_weight.T + in_proj_bias
    ref = ref.reshape(tgt_len, bsz, 2 * embed_dim)
    q_ref = ref[..., :embed_dim] * (embed_dim ** -0.5)
    k_ref = ref[..., embed_dim:]
    assert jnp.allclose(q, q_ref, atol=1e-5, rtol=1e-5)
    assert jnp.allclose(k, k_ref, atol=1e-5, rtol=1e-5)

    print("KERNEL_OK")
</pallas_src>

<mosaic_0001>
module attributes {stable_mosaic.version = 11 : i64} {
  func.func @_in_proj_qk_fused_kernel(%arg0: i32, %arg1: memref<8x32xf32, #tpu.memory_space<vmem>>, %arg2: memref<32x64xf32, #tpu.memory_space<vmem>>, %arg3: memref<2x32xf32, #tpu.memory_space<vmem>>, %arg4: memref<8x32xf32, #tpu.memory_space<vmem>>, %arg5: memref<8x32xf32, #tpu.memory_space<vmem>>) attributes {dimension_semantics = [#tpu.dimension_semantics<parallel>], iteration_bounds = array<i64: 2>, scalar_prefetch = 0 : i64, scratch_operands = 0 : i64, tpu.core_type = #tpu.core_type<tc>, window_params = [{transform_indices = @transform_0, window_bounds = array<i64: 8, 32>}, {pipeline_mode = #tpu.pipeline_mode<synchronous>, transform_indices = @transform_1, window_bounds = array<i64: 32, 64>}, {pipeline_mode = #tpu.pipeline_mode<synchronous>, transform_indices = @transform_2, window_bounds = array<i64: 2, 32>}, {transform_indices = @transform_3, window_bounds = array<i64: 8, 32>}, {transform_indices = @transform_4, window_bounds = array<i64: 8, 32>}]} {
    %c0 = arith.constant 0 : index
    %c0_0 = arith.constant 0 : index
    %0 = vector.load %arg1[%c0, %c0_0] : memref<8x32xf32, #tpu.memory_space<vmem>>, vector<8x32xf32>
    %c0_1 = arith.constant 0 : index
    %c0_2 = arith.constant 0 : index
    %1 = vector.load %arg2[%c0_1, %c0_2] : memref<32x64xf32, #tpu.memory_space<vmem>>, vector<32x64xf32>
    %cst = arith.constant dense<0.000000e+00> : vector<8x64xf32>
    %2 = tpu.matmul %0, %1, %cst {dimension_numbers = #tpu.dot_dimension_numbers<[1], [0], [0], [1], [0, 0, 1, 1], [], []>} : vector<8x32xf32>, vector<32x64xf32>, vector<8x64xf32> -> vector<8x64xf32>
    %3 = vector.extract_strided_slice %2 {offsets = [0, 0], sizes = [8, 32], strides = [1, 1]} : vector<8x64xf32> to vector<8x32xf32>
    %4 = vector.extract_strided_slice %2 {offsets = [0, 32], sizes = [8, 32], strides = [1, 1]} : vector<8x64xf32> to vector<8x32xf32>
    %c0_3 = arith.constant 0 : index
    %c0_4 = arith.constant 0 : index
    %5 = vector.load %arg3[%c0_3, %c0_4] : memref<2x32xf32, #tpu.memory_space<vmem>>, vector<1x32xf32>
    %6 = vector.broadcast %5 : vector<1x32xf32> to vector<8x32xf32>
    %7 = arith.addf %3, %6 : vector<8x32xf32>
    %cst_5 = arith.constant 0.176776692 : f32
    %8 = vector.broadcast %cst_5 : f32 to vector<8x32xf32>
    %9 = arith.mulf %7, %8 : vector<8x32xf32>
    %c0_6 = arith.constant 0 : index
    %c0_7 = arith.constant 0 : index
    %10 = vector.load %arg4[%c0_6, %c0_7] : memref<8x32xf32, #tpu.memory_space<vmem>>, vector<8x32xf32>
    tpu.vector_store %arg4[%c0_6, %c0_7], %9 {strides = array<i32>} : memref<8x32xf32, #tpu.memory_space<vmem>>, vector<8x32xf32>,
    %c1 = arith.constant 1 : index
    %c0_8 = arith.constant 0 : index
    %11 = vector.load %arg3[%c1, %c0_8] : memref<2x32xf32, #tpu.memory_space<vmem>>, vector<1x32xf32>
    %12 = vector.broadcast %11 : vector<1x32xf32> to vector<8x32xf32>
    %13 = arith.addf %4, %12 : vector<8x32xf32>
    %c0_9 = arith.constant 0 : index
    %c0_10 = arith.constant 0 : index
    %14 = vector.load %arg5[%c0_9, %c0_10] : memref<8x32xf32, #tpu.memory_space<vmem>>, vector<8x32xf32>
    tpu.vector_store %arg5[%c0_9, %c0_10], %13 {strides = array<i32>} : memref<8x32xf32, #tpu.memory_space<vmem>>, vector<8x32xf32>,
    return
  }
  func.func @transform_0(%arg0: i32) -> (i32, i32) {
    %c0_i32 = arith.constant 0 : i32
    %c0_i32_0 = arith.constant 0 : i32
    return %arg0, %c0_i32 : i32, i32
  }
  func.func @transform_1(%arg0: i32) -> (i32, i32) {
    %c0_i32 = arith.constant 0 : i32
    %c0_i32_0 = arith.constant 0 : i32
    %c0_i32_1 = arith.constant 0 : i32
    return %c0_i32, %c0_i32_0 : i32, i32
  }
  func.func @transform_2(%arg0: i32) -> (i32, i32) {
    %c0_i32 = arith.constant 0 : i32
    %c0_i32_0 = arith.constant 0 : i32
    %c0_i32_1 = arith.constant 0 : i32
    return %c0_i32, %c0_i32_0 : i32, i32
  }
  func.func @transform_3(%arg0: i32) -> (i32, i32) {
    %c0_i32 = arith.constant 0 : i32
    %c0_i32_0 = arith.constant 0 : i32
    return %arg0, %c0_i32 : i32, i32
  }
  func.func @transform_4(%arg0: i32) -> (i32, i32) {
    %c0_i32 = arith.constant 0 : i32
    %c0_i32_0 = arith.constant 0 : i32
    return %arg0, %c0_i32 : i32, i32
  }
}

</mosaic_0001>

<bundles_post_ra>
// kernel: tpu_custom_call.1
= control target key start
LH: loop header
LB: loop body
LE: loop exit
PB: predicated region body
PF: predicated region fallthrough
CT: control target
= control target key end

     0   :  { %10 = vsyncpa [#allocation3], 0  ;;  %s1037_s0 = inlined_call_operand.hbm [shape: f32[16,32], index: 0, kind: input, shape index: {}]   ;;  %s1038_s1 = inlined_call_operand.hbm [shape: f32[32,64], index: 1, kind: input, shape index: {}]   ;;  %s1039_s2 = inlined_call_operand.vmem [shape: f32[2,32], index: 2, kind: input, shape index: {}]   ;;  %s1040_s3 = inlined_call_operand.hbm [shape: f32[16,32], index: 3, kind: output, shape index: {0}]   ;;  %s1041_s4 = inlined_call_operand.hbm [shape: f32[16,32], index: 4, kind: output, shape index: {1}]  }
   0x1   :  { %12 = vsyncpa [#allocation3 + $0x1], 0 }
   0x2   :  { %13 = vsyncpa [#allocation6], 0 }
   0x3   :  { %14 = vsyncpa [#allocation4], 0 }
   0x4   :  { %16 = vsyncpa [#allocation4 + $0x1], 0 }
   0x5   :  { %17 = vsyncpa [#allocation9], 0 }
   0x6   :  { %19 = vsyncpa [#allocation9 + $0x1], 0  ;;  %s794_s15 = smov 0   ;;  %s796_s16 = smov 0  }
   0x7   :  { %s798_s17 = smov 0   ;;  %s800_s18 = smov 0  }
   0x8 LB: > { %s815_s19 = sadd.s32 4294967295, %s756_s18   ;;  %s485_s20 = sadd.s32 4294967294, %s756_s18   ;;  %s756_s18 = sphi %s800_s18, %s1061_s18   ;;  %s752_s17 = sphi %s798_s17, %s1060_s17   ;;  %s748_s16 = sphi %s796_s16, %s1059_s16   ;;  %s744_s15 = sphi %s794_s15, %s1058_s15  }
   0x9   : > { %p45_p0 = scmp.ne.s32.totalorder %s748_s16, %s744_s15  ;;  %p1042_p1 = scmp.eq.s32.totalorder %s815_s19, 0 }
   0xa   : > { %p117_p3 = scmp.eq.s32.totalorder %s485_s20, 1  ;;  %p486_p5 = scmp.ge.s32.totalorder %s756_s18, 1 }
   0xb   : > { %p824_p4 = por %p1042_p1, %p45_p0  ;;  %p150_p7 = scmp.lt.s32.totalorder %s756_s18, 3 }
   0xc   : > { %p829_p6 = por %p117_p3, %p45_p0  ;;  %s758_s24 = smov [#allocation5]  }
   0xd   : > { %s1045_s21 = scalar_select %p824_p4, 1, 0 }
   0xe   : > { %s1046_s22 = scalar_select %p829_p6, 1, 0 }
   0xf   : > { %p834_p8 = pnand %p486_p5, %p150_p7  ;;  %s162_s25 = sshll.u32 %s758_s24, 4  ;;  %s838_s25 = int_to_ptr.vmem [resolvable:$true] %s162_s25 }
  0x10   : > { %s850_s27 = sadd.s32 1, %s756_s18   ;;  %s32_s28 = sadd.s32 1, %s752_s17 }
  0x11   : > { %s1047_s23 = scalar_select %p834_p8, 1, 0 }
  0x12   : > { %p537_p9 = pneg %p834_p8  ;;  %s29_s29 = ssub.s32 %s756_s18, %s850_s27 }
  0x13   : > { %s596_s6 = scalar_lea.hbm %s1038_s1, 512 }
  0x14   : > { %p845_p11 = pnand %p537_p9, %p1042_p1  ;;  %p597_p12 = scmp.ne.s32.totalorder %s1038_s1, %s596_s6 }
  0x15   : > { %p603_p5 = scmp.lt.u32.totalorder %s596_s6, %s1038_s1 }
  0x16   : > { %p598_p13 = pneg %p845_p11 }
  0x18   : > { %p599_p0 = pnand %p598_p13, %p597_p12 }
  0x1a   : > { %p600_p3 = pneg %p599_p0 }
  0x1c   : > { %p605_p7 = pnand %p603_p5, %p600_p3 }
  0x1e   : > { %608 = shalt.err (!%p605_p7)
}
  0x1f   : > { %s609_s11 = scalar_lea.vmem %s838_s25, 512  ;;  %p617_p2 = scmp.lt.s32.totalorder %s838_s25, %s838_s25 }
  0x20   : > { %p610_p9 = scmp.ne.s32.totalorder %s838_s25, %s609_s11  ;;  %p618_p6 = scmp.lt.s32.totalorder %s609_s11, %s609_s11 }
  0x22   : > { %p612_p10 = pnand %p610_p9, %p598_p13  ;;  %p619_p4 = por %p618_p6, %p617_p2 }
  0x24   : > { %p613_p1 = pneg %p612_p10 }
  0x26   : > { %p620_p8 = pnand %p619_p4, %p613_p1 }
  0x28   : > { %623 = shalt.err (!%p620_p8)
}
  0x29   : > { %s759_s12 = smov 128   ;;  %s760_s13 = smov 8  }
  0x2a   : > { %540 = dma.hbm_to_vmem [thread:$0]  (!%p845_p11), %s1038_s1, 512, %s838_s25, [#allocation6], %s759_s12, %s759_s12, %s760_s13  }
  0x2b   : > { %p30_p2 = scmp.eq.s32.totalorder %s29_s29, 0  ;;  %p39_p1 = scmp.ne.s32.totalorder %s752_s17, %s748_s16 }
  0x2c   : > { %p40_p4 = scmp.eq.s32.totalorder %s756_s18, 0  ;;  %p553_p6 = scmp.lt.s32.totalorder %s756_s18, 2 }
  0x2d   : > { %s881_s24 = scalar_select %p30_p2, %s752_s17, %s32_s28  }
  0x2e   : > { %p41_p8 = por %p40_p4, %p39_p1  ;;  %p1049_p10 = scmp.eq.s32.totalorder %s815_s19, 1 }
  0x2f   : > { %s179_s5 = sand.u32 1, %s752_s17   ;;  %s490_s6 = sshll.u32 %s756_s18, 7 }
  0x30   : > { %p885_p12 = por %p1049_p10, %p39_p1  ;;  %s489_s7 = sshll.u32 %s179_s5, 3 }
  0x31   : > { %s894_s9 = scalar_lea.hbm %s1037_s0, %s490_s6  ;;  %s183_s25 = scalar_lea.vmem [#allocation2], %s489_s7 }
  0x32   : > { %s190_s28 = sshll.u32 %s183_s25, 4  ;;  %p896_p11 = pnand %p553_p6, %p41_p8  ;;  %s900_s28 = int_to_ptr.vmem [resolvable:$true] %s190_s28 }
  0x33   : > { %s180_s10 = scalar_lea.sflag [#allocation3], %s179_s5  ;;  %s624_s11 = scalar_lea.hbm %s894_s9, 128 }
  0x34   : > { %p625_p13 = scmp.ne.s32.totalorder %s894_s9, %s624_s11  ;;  %p626_p0 = pneg %p896_p11 }
  0x35   : > { %s629_s14 = scalar_lea.hbm %s1037_s0, 256  ;;  %p630_p7 = scmp.lt.u32.totalorder %s894_s9, %s1037_s0 }
  0x36   : > { %p627_p3 = pnand %p626_p0, %p625_p13  ;;  %p631_p9 = scmp.lt.u32.totalorder %s629_s14, %s624_s11 }
  0x37   : > { %p633_p1 = scmp.lt.u32.totalorder %s624_s11, %s894_s9 }
  0x38   : > { %p628_p5 = pneg %p627_p3  ;;  %p632_p2 = por %p631_p9, %p630_p7 }
  0x3a   : > { %p634_p4 = por %p633_p1, %p632_p2 }
  0x3c   : > { %p635_p6 = pnand %p634_p4, %p628_p5 }
  0x3e   : > { %638 = shalt.err (!%p635_p6)
}
  0x3f   : > { %s639_s5 = scalar_lea.vmem %s900_s28, 128  ;;  %s761_s7 = smov [#allocation2]  }
  0x40   : > { %p640_p8 = scmp.ne.s32.totalorder %s900_s28, %s639_s5  ;;  %s644_s26 = sshll.u32 %s761_s7, 4  ;;  %s645_s26 = int_to_ptr.vmem [resolvable:$false] %s644_s26 }
  0x41   : > { %s646_s8 = scalar_lea.vmem %s645_s26, 256  ;;  %p647_p3 = scmp.lt.s32.totalorder %s900_s28, %s645_s26 }
  0x42   : > { %p642_p10 = pnand %p640_p8, %p626_p0  ;;  %p648_p7 = scmp.lt.s32.totalorder %s646_s8, %s639_s5 }
  0x44   : > { %p643_p13 = pneg %p642_p10  ;;  %p649_p9 = por %p648_p7, %p647_p3 }
  0x46   : > { %p650_p2 = pnand %p649_p9, %p643_p13 }
  0x48   : > { %653 = shalt.err (!%p650_p2)
}
  0x49   : > { %544 = dma.hbm_to_vmem [thread:$0]  (!%p896_p11), %s894_s9, 128, %s900_s28, %s180_s10  }
  0x4a   : > { %p1052_p5 = scmp.ne.s32.totalorder %s1047_s23, 0 }
  0x4b   : > { %s930_s25 = sand.u32 (!%p1052_p5), 1, %s748_s16   ;;  %p1053_p0 = scmp.ne.s32.totalorder (!%p1052_p5), %s1045_s21, 0 }
  0x4c   : > { %199 = sbr.rel (%p1052_p5) target bundleno = 440 (0x1b8), region = 32  ;;  %s933_s11 = sshll.u32 (!%p1052_p5), %s930_s25, 3 }
  0x4d   : > { %s202_s12 = scalar_lea.sflag (!%p1052_p5), [#allocation3], %s930_s25  ;;  %s205_s13 = scalar_lea.vmem (!%p1052_p5), [#allocation2], %s933_s11 }
  0x53   : > { %727 = dma.done.wait (%p1053_p0), %s202_s12, 128  }
  0x54   : > { %729 = vsyncadd (%p1053_p0), %s202_s12, 4294967168  ;;  %p1054_p11 = scmp.eq.s32.totalorder %s815_s19, 0 }
  0x56   : > { %731 = dma.done.wait (%p1054_p11), [#allocation6], 512   ;;  %p1055_p1 = pmov %p1054_p11 }
  0x57   : > { %v762_v0 = vmov 0.0|0.0   ;;  %vm763_vm0 = vmmov 0   ;;  %v764_v1 = vmov 0.0   ;;  %v240_v2 = vld [vmem:[#allocation5] sm:$0xff]  ;;  %v241_v3 = vld [vmem:[#allocation5 + $0x8] sm:$0xff]  ;;  %v242_v4 = vld [vmem:[#allocation5 + $0x10] sm:$0xff] }
  0x58   : > { %733 = vsyncadd (%p1055_p1), [#allocation6], 4294966784  ;;  %521 = vmatprep.subr.bf16.mxu0 %v762_v0  ;;  %518 = vmatprep.mubr.msk.f32.mxu0 %vm763_vm0, %v764_v1  ;;  %v522_v5 = vpack.c.bf16 %v241_v3, %v240_v2  ;;  %v243_v6 = vld [vmem:[#allocation5 + $0x18] sm:$0xff]  ;;  %v498_v7 = vld [vmem:[%s1039_s2 + $0x1] ss:$0 sm:$0xff]  ;;  %s765_s9 = smov 32  }
  0x59   : > { %332 = vrot.lane.b32.xlu0 %v498_v7, %s765_s9  ;;  %v525_v8 = vpack.c.bf16 %v243_v6, %v242_v4  ;;  %v239_v9 = vld [vmem:[%s205_s13] sm:$0xff]  ;;  %vm244_vm1 = vcmask 261120   ;;  %s501_s10 = sshll.u32 %s815_s19, 7  ;;  %s231_s14 = scalar_lea.vmem [#allocation7], %s933_s11 }
  0x5a   : > { %523 = vmatpush3.bf16.msra.mxu0 %v522_v5  ;;  %v497_v11 = vld [vmem:[%s1039_s2] ss:$0 sm:$0xff]  ;;  %s360_s20 = sshll.u32 %s231_s14, 4  ;;  %s766_s6 = smov 96   ;;  %s961_s20 = int_to_ptr.vmem [resolvable:$true] %s360_s20 }
  0x5b   : > { %524 = vmatprep.subr.bf16.mxu0 %v762_v0  ;;  %s959_s26 = scalar_lea.hbm %s1040_s3, %s501_s10  ;;  %s342_s8 = scalar_lea.sflag [#allocation4], %s930_s25 }
  0x5c   : > { %s654_s12 = scalar_lea.vmem %s961_s20, 128  ;;  %s767_s13 = smov [#allocation7]  }
  0x5d   : > { %p655_p4 = scmp.ne.s32.totalorder %s961_s20, %s654_s12  ;;  %s658_s21 = sshll.u32 %s767_s13, 4  ;;  %s659_s21 = int_to_ptr.vmem [resolvable:$false] %s658_s21 }
  0x5e   : > { %526 = vmatpush3.bf16.msra.mxu0 %v525_v8  ;;  %s660_s23 = scalar_lea.vmem %s659_s21, 256  ;;  %p661_p10 = scmp.lt.s32.totalorder %s961_s20, %s659_s21 }
  0x5f   : > { %p656_p6 = pnand %p655_p4, %p885_p12  ;;  %p662_p13 = scmp.lt.s32.totalorder %s660_s23, %s654_s12 }
  0x61   : > { %519 = vmatmul.mubr.msk.f32.vlgmr.msra.gmra.mrb[0].mxu0 %vm244_vm1, %v239_v9  ;;  %p657_p8 = pneg %p656_p6  ;;  %p663_p3 = por %p662_p13, %p661_p10 }
  0x63   : > { %p664_p7 = pnand %p663_p3, %p657_p8 }
  0xcb   : > { %v333_v10 = vpop.permute.xlu0 %332 }
 0x134   : > { %v314_v12 = vpop.f32.mrb[0].mxu0 }
 0x135   : > { %v323_v13 = vadd.f32 %v497_v11, %v314_v12  ;;  %v335_v14 = vadd.f32 %v333_v10, %v314_v12  ;;  %v520_v15 = vpop.f32.mrb[1].mxu0 }
 0x137   : > { %v324_v16 = vmul.f32 0.17677669, %v323_v13  ;;  %337 = vrot.lane.b32.xlu0 %v335_v14, %s766_s6 }
 0x139   : > { %325 = vst.msk [vmem:[%s231_s14] sm:$0xff] %vm244_vm1, %v324_v16 }
 0x13a   : > { %667 = shalt.err (!%p664_p7)
}
 0x13b   : > { %s668_s9 = scalar_lea.hbm %s959_s26, 128  ;;  %s672_s14 = scalar_lea.hbm %s1040_s3, 256 }
 0x13c   : > { %p669_p9 = scmp.ne.s32.totalorder %s959_s26, %s668_s9  ;;  %p673_p0 = scmp.lt.u32.totalorder %s959_s26, %s1040_s3 }
 0x13d   : > { %p674_p11 = scmp.lt.u32.totalorder %s672_s14, %s668_s9  ;;  %p676_p4 = scmp.lt.u32.totalorder %s668_s9, %s959_s26 }
 0x13e   : > { %p670_p2 = pnand %p669_p9, %p885_p12 }
 0x13f   : > { %p675_p1 = por %p674_p11, %p673_p0 }
 0x140   : > { %p671_p5 = pneg %p670_p2 }
 0x141   : > { %p677_p6 = por %p676_p4, %p675_p1 }
 0x143   : > { %p678_p8 = pnand %p677_p6, %p671_p5 }
 0x145   : > { %681 = shalt.err (!%p678_p8)
}
 0x146   : > { %533 = dma.vmem_to_hbm [thread:$0]  (%p885_p12), %s961_s20, 128, %s959_s26, %s342_s8  }
 0x147   : > { %s238_s7 = scalar_lea.vmem [#allocation8], %s933_s11  ;;  %s992_s23 = scalar_lea.hbm %s1041_s4, %s501_s10 }
 0x148   : > { %s373_s12 = sshll.u32 %s238_s7, 4  ;;  %s347_s9 = scalar_lea.sflag [#allocation9], %s930_s25  ;;  %s994_s12 = int_to_ptr.vmem [resolvable:$true] %s373_s12 }
 0x149   : > { %s682_s28 = scalar_lea.vmem %s994_s12, 128  ;;  %s768_s19 = smov [#allocation8]  }
 0x14a   : > { %p683_p10 = scmp.ne.s32.totalorder %s994_s12, %s682_s28  ;;  %s686_s11 = sshll.u32 %s768_s19, 4  ;;  %s687_s11 = int_to_ptr.vmem [resolvable:$false] %s686_s11 }
 0x14b   : > { %s688_s20 = scalar_lea.vmem %s687_s11, 256  ;;  %p689_p7 = scmp.lt.s32.totalorder %s994_s12, %s687_s11 }
 0x14c   : > { %p684_p13 = pnand %p683_p10, %p885_p12  ;;  %p690_p9 = scmp.lt.s32.totalorder %s688_s20, %s682_s28 }
 0x14e   : > { %p685_p3 = pneg %p684_p13  ;;  %p691_p2 = por %p690_p9, %p689_p7 }
 0x150   : > { %p692_p5 = pnand %p691_p2, %p685_p3 }
 0x1a9   : > { %v338_v17 = vpop.permute.xlu0 %337 }
 0x1aa   : > { %340 = vst.msk [vmem:[%s238_s7] sm:$0xff] %vm244_vm1, %v338_v17 }
 0x1ab   : > { %695 = shalt.err (!%p692_p5)
}
 0x1ac   : > { %s696_s25 = scalar_lea.hbm %s992_s23, 128  ;;  %s700_s8 = scalar_lea.hbm %s1041_s4, 256 }
 0x1ad   : > { %p697_p0 = scmp.ne.s32.totalorder %s992_s23, %s696_s25  ;;  %p701_p4 = scmp.lt.u32.totalorder %s992_s23, %s1041_s4 }
 0x1ae   : > { %p702_p6 = scmp.lt.u32.totalorder %s700_s8, %s696_s25  ;;  %p704_p10 = scmp.lt.u32.totalorder %s696_s25, %s992_s23 }
 0x1af   : > { %p698_p11 = pnand %p697_p0, %p885_p12 }
 0x1b0   : > { %p703_p8 = por %p702_p6, %p701_p4 }
 0x1b1   : > { %p699_p1 = pneg %p698_p11 }
 0x1b2   : > { %p705_p13 = por %p704_p10, %p703_p8 }
 0x1b4   : > { %p706_p3 = pnand %p705_p13, %p699_p1 }
 0x1b6   : > { %709 = shalt.err (!%p706_p3)
}
 0x1b7   : > { %534 = dma.vmem_to_hbm [thread:$0]  (%p885_p12), %s994_s12, 128, %s992_s23, %s347_s9  }
 0x1b8 PF: > { %s385_s6 = sand.u32 1, %s744_s15   ;;  %p1056_p7 = scmp.ne.s32.totalorder %s1046_s22, 0 }
 0x1b9   : > { %p1057_p9 = scmp.ge.s32.totalorder %s756_s18, 2  ;;  %s386_s5 = scalar_lea.sflag [#allocation4], %s385_s6 }
 0x1bb   : > { %p546_p2 = pnand %p1057_p9, %p1056_p7 }
 0x1bd   : > { %735 = dma.done.wait (!%p546_p2), %s386_s5, 128  }
 0x1be   : > { %737 = vsyncadd (!%p546_p2), %s386_s5, 4294967168  ;;  %s395_s7 = scalar_lea.sflag [#allocation9], %s385_s6 }
 0x1bf   : > { %739 = dma.done.wait (!%p546_p2), %s395_s7, 128  }
 0x1c0   : > { %741 = vsyncadd (!%p546_p2), %s395_s7, 4294967168  ;;  %p22_p12 = scmp.ge.s32.totalorder %s850_s27, 4   ;;  %s1058_s15 = smov %s748_s16 }
 0x1c1   : > { %s1059_s16 = smov %s752_s17  ;;  %s1060_s17 = smov %s881_s24 }
 0x1c2   : > { %s1061_s18 = smov %s850_s27  ;;  %24 = sbr.rel (!%p22_p12) target bundleno = 8 (0x8), region = 98 }
 0x1c9   :  { %400 = vsyncpa [#allocation3], 1 }
 0x1ca   :  { %402 = vsyncpa [#allocation3 + $0x1], 1 }
 0x1cb   :  { %403 = vsyncpa [#allocation6], 1 }
 0x1cc   :  { %404 = vsyncpa [#allocation4], 1 }
 0x1cd   :  { %406 = vsyncpa [#allocation4 + $0x1], 1 }
 0x1ce   :  { %407 = vsyncpa [#allocation9], 1 }
 0x1cf   :  { %409 = vsyncpa [#allocation9 + $0x1], 1 }

</bundles_post_ra>
